<compile_context>
chip_gen: v5e
topology: v5e:2x2
jax: 0.10.0
libtpu: 0.0.40
codegen_flags: <defaults>
</compile_context>

<pallas_src>
import jax
import jax.numpy as jnp
from jax.experimental import pallas as pl
from jax.experimental.pallas import tpu as pltpu


def dense_att_kernel(sl_ref, sr_ref, adj_ref, out_ref):
    # sl_ref: (TM, 1) f32, sr_ref: (1, TN) f32, adj_ref/out_ref: (TM, TN)
    logits = sl_ref[...] + sr_ref[...]                       # broadcast -> (TM, TN)
    att = jax.nn.sigmoid(logits)                             # EUP exp + VPU, hidden under DMA
    out_ref[...] = adj_ref[...].astype(jnp.float32) * att


def _round_up(a, b):
    return ((a + b - 1) // b) * b


def dense_att(x, adj, weight, bias, *, tm=512, tn=1024):
    """x: (n, d), adj: (n, n) dense mask (any float/int dtype), weight: (1, 2d), bias: (1,)."""
    n, d = x.shape
    xf = x.astype(jnp.float32)
    w = weight.astype(jnp.float32)

    # Prologue (plain XLA, negligible vs the (n, n) traffic): split the Linear
    # weight into the halves acting on x[i] and x[j]; fold the bias into s_left.
    w_left = w[:, :d].T                                      # (d, 1)
    w_right = w[:, d:].T                                     # (d, 1)
    s_left = xf @ w_left + bias.astype(jnp.float32)          # (n, 1)
    s_right = (xf @ w_right).reshape(1, n)                   # (1, n) lane-dense, no in-kernel transpose

    # Lane-dense tiles: TN multiple of 128, TM multiple of 8, clamped to the
    # (padded) problem size. Footprint at (512, 1024) f32: 2 MiB adj + 2 MiB out
    # per buffer, x2 double-buffering = 8 MiB -> safe on v7x's 64 MiB VMEM.
    tm_eff = min(tm, _round_up(n, 8))
    tn_eff = min(tn, _round_up(n, 128))
    n_rows = _round_up(n, tm_eff)
    n_cols = _round_up(n, tn_eff)

    pad_r = n_rows - n
    pad_c = n_cols - n
    adj_p = jnp.pad(adj, ((0, pad_r), (0, pad_c)))           # zero-padded edges -> masked to 0
    sl_p = jnp.pad(s_left, ((0, pad_r), (0, 0)))
    sr_p = jnp.pad(s_right, ((0, 0), (0, pad_c)))

    grid = (n_rows // tm_eff, n_cols // tn_eff)

    grid_spec = pl.GridSpec(
        grid=grid,
        in_specs=[
            pl.BlockSpec((tm_eff, 1), lambda i, j: (i, 0)),        # s_left (+bias) column
            pl.BlockSpec((1, tn_eff), lambda i, j: (0, j)),        # s_right row
            pl.BlockSpec((tm_eff, tn_eff), lambda i, j: (i, j)),   # adj tile
        ],
        out_specs=pl.BlockSpec((tm_eff, tn_eff), lambda i, j: (i, j)),
    )

    out = pl.pallas_call(
        dense_att_kernel,
        out_shape=jax.ShapeDtypeStruct((n_rows, n_cols), jnp.float32),
        grid_spec=grid_spec,
        compiler_params=pltpu.CompilerParams(
            # Independent output tiles: shard across both TCs on v7x; neutral on v5e/v6e.
            dimension_semantics=("parallel", "parallel"),
            vmem_limit_bytes=48 * 1024 * 1024,
        ),
    )(sl_p, sr_p, adj_p)

    return out[:n, :n]


def dense_att_reference(x, adj, weight, bias):
    """Pure-JAX re-statement of the PyTorch forward for correctness checking."""
    n = x.shape[0]
    x_left = jnp.broadcast_to(x[:, None, :], (n, n, x.shape[1]))
    x_right = jnp.broadcast_to(x[None, :, :], (n, n, x.shape[1]))
    x_cat = jnp.concatenate([x_left, x_right], axis=2)               # (n, n, 2d)
    att = jnp.squeeze(x_cat @ weight.T + bias, axis=-1)              # (n, n)
    att = jax.nn.sigmoid(att)
    return adj.astype(jnp.float32) * att


if __name__ == "__main__":
    in_features = 32
    n = 8  # number of nodes

    key = jax.random.PRNGKey(0)
    kx, kadj, kw, kb = jax.random.split(key, 4)

    x = jax.random.normal(kx, (n, in_features), dtype=jnp.float32)
    # Dense 0/1 adjacency (stand-in for adj.to_dense()).
    adj = (jax.random.uniform(kadj, (n, n)) > 0.5).astype(jnp.float32)

    # Deterministic nn.Linear(2*in_features, 1) init: U(-1/sqrt(fan_in), +).
    fan_in = 2 * in_features
    bound = 1.0 / jnp.sqrt(jnp.float32(fan_in))
    weight = jax.random.uniform(kw, (1, fan_in), minval=-bound, maxval=bound,
                                dtype=jnp.float32)
    bias = jax.random.uniform(kb, (1,), minval=-bound, maxval=bound,
                              dtype=jnp.float32)

    out = dense_att(x, adj, weight, bias)
    out = jax.block_until_ready(out)

    ref = dense_att_reference(x, adj, weight, bias)
    assert out.shape == (n, n)
    assert jnp.allclose(out, ref, atol=1e-5, rtol=1e-5), "mismatch vs reference"

    print("KERNEL_OK")
</pallas_src>

<mosaic_0001>
module attributes {stable_mosaic.version = 11 : i64} {
  func.func @dense_att_kernel(%arg0: i32, %arg1: i32, %arg2: memref<8x1xf32, #tpu.memory_space<vmem>>, %arg3: memref<1x128xf32, #tpu.memory_space<vmem>>, %arg4: memref<8x128xf32, #tpu.memory_space<vmem>>, %arg5: memref<8x128xf32, #tpu.memory_space<vmem>>) attributes {dimension_semantics = [#tpu.dimension_semantics<parallel>, #tpu.dimension_semantics<parallel>], iteration_bounds = array<i64: 1, 1>, scalar_prefetch = 0 : i64, scratch_operands = 0 : i64, tpu.core_type = #tpu.core_type<tc>, window_params = [{transform_indices = @transform_0, window_bounds = array<i64: 8, 1>}, {transform_indices = @transform_1, window_bounds = array<i64: 1, 128>}, {transform_indices = @transform_2, window_bounds = array<i64: 8, 128>}, {transform_indices = @transform_3, window_bounds = array<i64: 8, 128>}]} {
    %c0 = arith.constant 0 : index
    %c0_0 = arith.constant 0 : index
    %0 = vector.load %arg2[%c0, %c0_0] : memref<8x1xf32, #tpu.memory_space<vmem>>, vector<8x1xf32>
    %c0_1 = arith.constant 0 : index
    %c0_2 = arith.constant 0 : index
    %1 = vector.load %arg3[%c0_1, %c0_2] : memref<1x128xf32, #tpu.memory_space<vmem>>, vector<1x128xf32>
    %2 = vector.broadcast %0 : vector<8x1xf32> to vector<8x128xf32>
    %3 = vector.broadcast %1 : vector<1x128xf32> to vector<8x128xf32>
    %4 = arith.addf %2, %3 : vector<8x128xf32>
    %5 = arith.negf %4 : vector<8x128xf32>
    %6 = math.exp %5 : vector<8x128xf32>
    %cst = arith.constant 1.000000e+00 : f32
    %7 = vector.broadcast %cst : f32 to vector<8x128xf32>
    %8 = arith.addf %7, %6 : vector<8x128xf32>
    %9 = arith.divf %7, %8 : vector<8x128xf32>
    %c0_3 = arith.constant 0 : index
    %c0_4 = arith.constant 0 : index
    %10 = vector.load %arg4[%c0_3, %c0_4] : memref<8x128xf32, #tpu.memory_space<vmem>>, vector<8x128xf32>
    %11 = arith.mulf %10, %9 : vector<8x128xf32>
    %c0_5 = arith.constant 0 : index
    %c0_6 = arith.constant 0 : index
    %12 = vector.load %arg5[%c0_5, %c0_6] : memref<8x128xf32, #tpu.memory_space<vmem>>, vector<8x128xf32>
    tpu.vector_store %arg5[%c0_5, %c0_6], %11 {strides = array<i32>} : memref<8x128xf32, #tpu.memory_space<vmem>>, vector<8x128xf32>,
    return
  }
  func.func @transform_0(%arg0: i32, %arg1: i32) -> (i32, i32) {
    %c0_i32 = arith.constant 0 : i32
    %c0_i32_0 = arith.constant 0 : i32
    return %arg0, %c0_i32 : i32, i32
  }
  func.func @transform_1(%arg0: i32, %arg1: i32) -> (i32, i32) {
    %c0_i32 = arith.constant 0 : i32
    %c0_i32_0 = arith.constant 0 : i32
    return %c0_i32, %arg1 : i32, i32
  }
  func.func @transform_2(%arg0: i32, %arg1: i32) -> (i32, i32) {
    %c0_i32 = arith.constant 0 : i32
    return %arg0, %arg1 : i32, i32
  }
  func.func @transform_3(%arg0: i32, %arg1: i32) -> (i32, i32) {
    %c0_i32 = arith.constant 0 : i32
    return %arg0, %arg1 : i32, i32
  }
}

</mosaic_0001>

<bundles_post_ra>
// kernel: tpu_custom_call.1
= control target key start
LH: loop header
LB: loop body
LE: loop exit
PB: predicated region body
PF: predicated region fallthrough
CT: control target
= control target key end

     0   :  { %v99_v1 = vmov 0   ;;  %s133_s0 = inlined_call_operand.vmem [shape: f32[8,1], index: 0, kind: input, shape index: {}]   ;;  %s134_s1 = inlined_call_operand.vmem [shape: f32[1,128], index: 1, kind: input, shape index: {}]   ;;  %s135_s2 = inlined_call_operand.vmem [shape: f32[8,128], index: 2, kind: input, shape index: {}]   ;;  %s136_s3 = inlined_call_operand.hbm [shape: f32[8,128], index: 3, kind: output, shape index: {}]  }
   0x1   :  { %v15_v0 = vld [vmem:[%s133_s0] sm:$0xff]  ;;  %67 = vset.pattern.permute.xlu0 %v99_v1 }
   0x2   :  { %8 = vsyncpa [#allocation3], 0  ;;  %19 = vperm.xlu0 %67, %v15_v0   ;;  %v68_v2 = vld [vmem:[%s134_s1] ss:$0 sm:$0xff]  ;;  %s100_s16 = smov [#allocation2]   ;;  %s55_s20 = sshll.u32 %s136_s3, 4  ;;  %s56_s20 = int_to_ptr.hbm [resolvable:$true] %s55_s20 }
   0x3   :  { %v45_v16 = vld [vmem:[%s135_s2] sm:$0xff]  ;;  %s53_s17 = sshll.u32 %s100_s16, 4  ;;  %s54_s17 = int_to_ptr.vmem [resolvable:$true] %s53_s17 }
  0x74   :  { %v20_v3 = vpop.permute.xlu0 %19 }
  0x75   :  { %v25_v4 = vadd.f32 %v68_v2, %v20_v3 }
  0x77   :  { %v64_v5 = vmul.f32 -1.442695, %v25_v4 }
  0x79   :  { %69 = vpow2.f32 %v64_v5 }
  0x7f   :  { %v70_v6 = vpop.eup %69 }
  0x80   :  { %v29_v7 = vadd.f32 1.0, %v70_v6 }
  0x82   :  { %71 = vrcp.f32 %v29_v7  ;;  %v41_v11 = vand.u32 2147483648, %v29_v7  ;;  %v39_v13 = vand.u32 2147483647, %v29_v7  ;;  %vm35_vm1 = vweird.f32 %v29_v7 }
  0x84   :  { %v42_v15 = vor.u32 1.1754944e-38, %v41_v11  ;;  %vm40_vm3 = vcmp.eq.f32.partialorder %v39_v13, 8.507059e+37 }
  0x88   :  { %v72_v8 = vpop.eup %71 }
  0x89   :  { %v31_v9 = vmul.f32 %v72_v8, %v29_v7  ;;  %vm36_vm0 = vweird.f32 %v72_v8 }
  0x8a   :  { %vm37_vm2 = vmor %vm35_vm1, %vm36_vm0 }
  0x8b   :  { %v32_v10 = vsub.f32 1.0, %v31_v9 }
  0x8d   :  { %v33_v12 = vmul.f32 %v72_v8, %v32_v10 }
  0x8f   :  { %v34_v14 = vadd.f32 %v72_v8, %v33_v12 }
  0x91   :  { %v38_v17 = vsel %vm37_vm2, %v72_v8, %v34_v14 }
  0x92   :  { %v43_v18 = vsel %vm40_vm3, %v42_v15, %v38_v17 }
  0x93   :  { %v46_v19 = vmul.f32 %v45_v16, %v43_v18 }
  0x95   :  { %47 = vst [vmem:[#allocation2] sm:$0xff] %v46_v19 }
  0x96   :  { %58 = dma.vmem_to_hbm [thread:$0]  %s54_s17, 128, %s56_s20, [#allocation3]  }
  0x97   :  { %97 = dma.done.wait [#allocation3], 128  }
  0x98   :  { %98 = vsyncadd [#allocation3], 4294967168 }
  0x99   :  { %63 = vsyncpa [#allocation3], 1 }

</bundles_post_ra>
